<compile_context>
chip_gen: v7x
topology: tpu7x:2x2x1
jax: 0.10.0
libtpu: 0.0.40
codegen_flags: <defaults>
</compile_context>

<pallas_src>
import functools

import jax
import jax.numpy as jnp
from jax.experimental import pallas as pl
from jax.experimental.pallas import tpu as pltpu

EPS = 1e-5
NEG_SLOPE = 0.01            # nn.LeakyReLU default
MXU_DTYPE = jnp.float32     # set to jnp.bfloat16 at real VGG channel counts (f32 kept
                            # here for exact parity with the fp32 PyTorch forward)


def _leaky(x):
    return jnp.where(x >= 0, x, NEG_SLOPE * x)


def _shift_l(x, d):
    """s[:, l] = x[:, l + d], zero where l + d falls outside [0, L)."""
    C, L = x.shape
    if d == 0:
        return x
    z = jnp.zeros((C, abs(d)), x.dtype)
    if d > 0:
        return jnp.concatenate([x[:, d:], z], axis=1)
    return jnp.concatenate([z, x[:, :L + d]], axis=1)


def _im2col(x, ks):
    """Stack the ks shifted (zero-boundary) views along the sublane axis -> (ks*C, L)."""
    pad = (ks - 1) // 2
    return jnp.concatenate([_shift_l(x, k - pad) for k in range(ks)], axis=0)


# --------------------------------- fused kernel ---------------------------------
def _fused_vgg_kernel(x_ref, w1_ref, w2_ref, g1_ref, be1_ref, g2_ref, be2_ref,
                      o_ref, h1_s, h2_s, s1_s, s2_s, *, ks, bn, length, count):
    p = pl.program_id(0)                     # phase: 0 conv1, 1 bn1+conv2, 2 bn2
    nb = pl.program_id(1)                    # batch-tile index
    last = pl.num_programs(1) - 1

    def stats(h):
        return jnp.concatenate([jnp.sum(h, axis=1, keepdims=True),
                                jnp.sum(h * h, axis=1, keepdims=True)], axis=1)

    def fold(s_ref, g_ref, be_ref):
        # Overwrite the (sum, sum_sq) scratch in place with folded (scale, shift).
        mean = s_ref[:, 0:1] / count
        var = s_ref[:, 1:2] / count - mean * mean     # biased var, as PyTorch train BN
        scale = g_ref[...] * jax.lax.rsqrt(var + EPS)
        shift = be_ref[...] - mean * scale
        s_ref[...] = jnp.concatenate([scale, shift], axis=1)

    def im2col_lane_folded(y):
        # y: (C, bn*length) lane-folded tile; shifts are done per sample so the
        # zero conv padding never leaks across sample boundaries.
        cols = [_im2col(y[:, i * length:(i + 1) * length], ks) for i in range(bn)]
        return jnp.concatenate(cols, axis=1)          # (ks*C, bn*length)

    # ---- phase 0: conv1 (bias folded into BN) + BN1 partial stats ----------------
    @pl.when(p == 0)
    def _():
        @pl.when(nb == 0)
        def _():
            s1_s[...] = jnp.zeros_like(s1_s)

        xb = x_ref[...]                                               # (bn, Cin, L)
        xs = jnp.concatenate([_im2col(xb[i], ks) for i in range(bn)],
                             axis=1)                                  # (ks*Cin, bn*L)
        h = jnp.dot(w1_ref[...].astype(MXU_DTYPE), xs.astype(MXU_DTYPE),
                    preferred_element_type=jnp.float32)               # (Cmid, bn*L)
        h1_s[nb] = h
        s1_s[...] += stats(h)

        @pl.when(nb == last)
        def _():
            fold(s1_s, g1_ref, be1_ref)

    # ---- phase 1: BN1 + LeakyReLU + conv2 + BN2 partial stats --------------------
    @pl.when(p == 1)
    def _():
        @pl.when(nb == 0)
        def _():
            s2_s[...] = jnp.zeros_like(s2_s)

        y = _leaky(h1_s[nb] * s1_s[:, 0:1] + s1_s[:, 1:2])            # (Cmid, bn*L)
        ys = im2col_lane_folded(y)                                    # (ks*Cmid, bn*L)
        h2 = jnp.dot(w2_ref[...].astype(MXU_DTYPE), ys.astype(MXU_DTYPE),
                     preferred_element_type=jnp.float32)              # (Cout, bn*L)
        h2_s[nb] = h2
        s2_s[...] += stats(h2)

        @pl.when(nb == last)
        def _():
            fold(s2_s, g2_ref, be2_ref)

    # ---- phase 2: BN2 + LeakyReLU + write output ---------------------------------
    @pl.when(p == 2)
    def _():
        z = _leaky(h2_s[nb] * s2_s[:, 0:1] + s2_s[:, 1:2])            # (Cout, bn*L)
        for i in range(bn):
            o_ref[i] = z[:, i * length:(i + 1) * length]


# ----------------------------------- wrapper ------------------------------------
@functools.partial(jax.jit, static_argnames=("batch_tile",))
def vgg_block_pallas(x, w1, b1, g1, be1, w2, b2, g2, be2, *, batch_tile=2):
    """x: (N, Cin, L) float32, PyTorch NCL layout.
    w1: (Cmid, Cin, ks), w2: (Cout, Cmid, ks) -- PyTorch Conv1d weight layout.
    b1/b2 accepted for interface parity but unused: training-mode BN immediately
    following each conv cancels a per-channel bias exactly."""
    del b1, b2
    N, Cin, L = x.shape
    Cmid, _, ks = w1.shape
    Cout = w2.shape[0]
    assert N % batch_tile == 0, "batch_tile must divide N"
    NB = N // batch_tile

    # im2col weight layout: w_r[co, k*Cin + ci] = w[co, ci, k]
    w1r = jnp.transpose(w1, (0, 2, 1)).reshape(Cmid, ks * Cin)
    w2r = jnp.transpose(w2, (0, 2, 1)).reshape(Cout, ks * Cmid)
    g1c, be1c = g1.reshape(Cmid, 1), be1.reshape(Cmid, 1)
    g2c, be2c = g2.reshape(Cout, 1), be2.reshape(Cout, 1)

    # VMEM gate for the fully fused single-call path.
    scratch_bytes = 4 * (N * L * (Cmid + Cout) + 2 * (Cmid + Cout))
    block_bytes = 4 * (2 * batch_tile * L * (Cin + Cout)
                       + Cmid * ks * Cin + Cout * ks * Cmid + 2 * (Cmid + Cout))
    needed = scratch_bytes + 2 * block_bytes
    # TODO(synk): multi-pass fallback (stats-only pass 1 + conv1 recompute) above this.
    assert needed < 24 * 1024 * 1024, "batch too large for fused single-call path"

    cparams = pltpu.CompilerParams(
        # Stats accumulate across batch tiles and phases are ordered -> sequential grid.
        dimension_semantics=("arbitrary", "arbitrary"),
        vmem_limit_bytes=min(48 * 1024 * 1024,
                             max(needed + (8 << 20), 16 * 1024 * 1024)),
    )

    const2d = lambda r, c: pl.BlockSpec((r, c), lambda p, n: (0, 0))

    out = pl.pallas_call(
        functools.partial(_fused_vgg_kernel, ks=ks, bn=batch_tile, length=L,
                          count=float(N * L)),
        grid=(3, NB),
        in_specs=[
            # x only needed in phase 0; pin the block index afterwards so the
            # pipeline does not re-fetch it.
            pl.BlockSpec((batch_tile, Cin, L),
                         lambda p, n: (jnp.where(p == 0, n, 0), 0, 0)),
            const2d(Cmid, ks * Cin),          # w1r (resident, fetched once)
            const2d(Cout, ks * Cmid),         # w2r
            const2d(Cmid, 1), const2d(Cmid, 1),   # gamma1, beta1
            const2d(Cout, 1), const2d(Cout, 1),   # gamma2, beta2
        ],
        # output only produced in phase 2; pin the block index before that so no
        # uninitialized writebacks happen in phases 0/1.
        out_specs=pl.BlockSpec((batch_tile, Cout, L),
                               lambda p, n: (jnp.where(p == 2, n, 0), 0, 0)),
        out_shape=jax.ShapeDtypeStruct((N, Cout, L), jnp.float32),
        scratch_shapes=[
            pltpu.VMEM((NB, Cmid, batch_tile * L), jnp.float32),   # h1 (never in HBM)
            pltpu.VMEM((NB, Cout, batch_tile * L), jnp.float32),   # h2 (never in HBM)
            pltpu.VMEM((Cmid, 2), jnp.float32),   # BN1 (sum,sumsq) -> (scale,shift)
            pltpu.VMEM((Cout, 2), jnp.float32),   # BN2 (sum,sumsq) -> (scale,shift)
        ],
        compiler_params=cparams,
    )(x, w1r, w2r, g1c, be1c, g2c, be2c)
    return out


# ------------------------------ pure-JAX reference -------------------------------
def vgg_block_ref(x, w1, b1, g1, be1, w2, b2, g2, be2):
    ks = w1.shape[2]
    pad = (ks - 1) // 2

    def conv1d(xx, w, b):
        y = jax.lax.conv_general_dilated(
            xx, w, window_strides=(1,), padding=[(pad, pad)],
            dimension_numbers=('NCH', 'OIH', 'NCH'))
        return y + b.reshape(1, -1, 1)

    def bn(xx, g, be):
        m = jnp.mean(xx, axis=(0, 2), keepdims=True)
        v = jnp.mean((xx - m) ** 2, axis=(0, 2), keepdims=True)
        return (xx - m) * jax.lax.rsqrt(v + EPS) * g.reshape(1, -1, 1) \
            + be.reshape(1, -1, 1)

    h = _leaky(bn(conv1d(x, w1, b1), g1, be1))
    return _leaky(bn(conv1d(h, w2, b2), g2, be2))


if __name__ == "__main__":
    # VGGBlock(in_channels=4, middle_channels=8, out_channels=4, ks=3)
    N, Cin, Cmid, Cout, ks = 4, 4, 8, 4, 3
    L = 256  # lane-dense length (multiple of 128)

    key = jax.random.PRNGKey(0)
    keys = jax.random.split(key, 9)
    w1 = 0.2 * jax.random.normal(keys[0], (Cmid, Cin, ks), jnp.float32)
    b1 = 0.1 * jax.random.normal(keys[1], (Cmid,), jnp.float32)
    g1 = 1.0 + 0.1 * jax.random.normal(keys[2], (Cmid,), jnp.float32)
    be1 = 0.1 * jax.random.normal(keys[3], (Cmid,), jnp.float32)
    w2 = 0.2 * jax.random.normal(keys[4], (Cout, Cmid, ks), jnp.float32)
    b2 = 0.1 * jax.random.normal(keys[5], (Cout,), jnp.float32)
    g2 = 1.0 + 0.1 * jax.random.normal(keys[6], (Cout,), jnp.float32)
    be2 = 0.1 * jax.random.normal(keys[7], (Cout,), jnp.float32)

    x = jax.random.normal(keys[8], (N, Cin, L), jnp.float32)  # PyTorch NCL layout

    out = vgg_block_pallas(x, w1, b1, g1, be1, w2, b2, g2, be2, batch_tile=2)
    out = jax.block_until_ready(out)

    ref = vgg_block_ref(x, w1, b1, g1, be1, w2, b2, g2, be2)
    assert out.shape == (N, Cout, L)
    max_err = float(jnp.max(jnp.abs(out - ref)))
    assert jnp.allclose(out, ref, rtol=5e-4, atol=5e-4), \
        f"mismatch vs JAX reference, max abs err = {max_err}"

    print("KERNEL_OK")
</pallas_src>

<mosaic_0001>
module attributes {stable_mosaic.version = 11 : i64} {
  func.func @_fused_vgg_kernel(%arg0: i32, %arg1: i32, %arg2: memref<2x4x256xf32, #tpu.memory_space<vmem>>, %arg3: memref<8x12xf32, #tpu.memory_space<vmem>>, %arg4: memref<4x24xf32, #tpu.memory_space<vmem>>, %arg5: memref<8x1xf32, #tpu.memory_space<vmem>>, %arg6: memref<8x1xf32, #tpu.memory_space<vmem>>, %arg7: memref<4x1xf32, #tpu.memory_space<vmem>>, %arg8: memref<4x1xf32, #tpu.memory_space<vmem>>, %arg9: memref<2x4x256xf32, #tpu.memory_space<vmem>>, %arg10: memref<2x8x512xf32, #tpu.memory_space<vmem>>, %arg11: memref<2x4x512xf32, #tpu.memory_space<vmem>>, %arg12: memref<8x2xf32, #tpu.memory_space<vmem>>, %arg13: memref<4x2xf32, #tpu.memory_space<vmem>>) attributes {dimension_semantics = [#tpu.dimension_semantics<arbitrary>, #tpu.dimension_semantics<arbitrary>], iteration_bounds = array<i64: 3, 2>, scalar_prefetch = 0 : i64, scratch_operands = 4 : i64, tpu.core_type = #tpu.core_type<tc>, window_params = [{transform_indices = @transform_0, window_bounds = array<i64: 2, 4, 256>}, {pipeline_mode = #tpu.pipeline_mode<synchronous>, transform_indices = @transform_1, window_bounds = array<i64: 8, 12>}, {pipeline_mode = #tpu.pipeline_mode<synchronous>, transform_indices = @transform_2, window_bounds = array<i64: 4, 24>}, {pipeline_mode = #tpu.pipeline_mode<synchronous>, transform_indices = @transform_3, window_bounds = array<i64: 8, 1>}, {pipeline_mode = #tpu.pipeline_mode<synchronous>, transform_indices = @transform_4, window_bounds = array<i64: 8, 1>}, {pipeline_mode = #tpu.pipeline_mode<synchronous>, transform_indices = @transform_5, window_bounds = array<i64: 4, 1>}, {pipeline_mode = #tpu.pipeline_mode<synchronous>, transform_indices = @transform_6, window_bounds = array<i64: 4, 1>}, {transform_indices = @transform_7, window_bounds = array<i64: 2, 4, 256>}]} {
    %c0_i32 = arith.constant 0 : i32
    %0 = arith.cmpi eq, %arg0, %c0_i32 : i32
    %1 = arith.extui %0 : i1 to i32
    %c0_i32_0 = arith.constant 0 : i32
    %2 = arith.cmpi ne, %1, %c0_i32_0 : i32
    scf.if %2 {
      %c0_i32_3 = arith.constant 0 : i32
      %9 = arith.cmpi eq, %arg1, %c0_i32_3 : i32
      %10 = arith.extui %9 : i1 to i32
      %c0_i32_4 = arith.constant 0 : i32
      %11 = arith.cmpi ne, %10, %c0_i32_4 : i32
      scf.if %11 {
        %cst_23 = arith.constant 0.000000e+00 : f32
        %50 = vector.broadcast %cst_23 : f32 to vector<8x2xf32>
        %c0_24 = arith.constant 0 : index
        %c0_25 = arith.constant 0 : index
        %51 = vector.load %arg12[%c0_24, %c0_25] : memref<8x2xf32, #tpu.memory_space<vmem>>, vector<8x2xf32>
        tpu.vector_store %arg12[%c0_24, %c0_25], %50 {strides = array<i32>} : memref<8x2xf32, #tpu.memory_space<vmem>>, vector<8x2xf32>,
      } else {
      }
      %c0 = arith.constant 0 : index
      %c0_5 = arith.constant 0 : index
      %c0_6 = arith.constant 0 : index
      %12 = vector.load %arg2[%c0, %c0_5, %c0_6] : memref<2x4x256xf32, #tpu.memory_space<vmem>>, vector<2x4x256xf32>
      %13 = vector.extract_strided_slice %12 {offsets = [0, 0, 0], sizes = [1, 4, 256], strides = [1, 1, 1]} : vector<2x4x256xf32> to vector<1x4x256xf32>
      %14 = vector.shape_cast %13 : vector<1x4x256xf32> to vector<4x256xf32>
      %cst = arith.constant 0.000000e+00 : f32
      %15 = vector.broadcast %cst : f32 to vector<4x1xf32>
      %16 = vector.extract_strided_slice %14 {offsets = [0, 0], sizes = [4, 255], strides = [1, 1]} : vector<4x256xf32> to vector<4x255xf32>
      %17 = tpu.concatenate %15, %16 in 1 : vector<4x1xf32>, vector<4x255xf32> -> vector<4x256xf32>
      %cst_7 = arith.constant 0.000000e+00 : f32
      %18 = vector.broadcast %cst_7 : f32 to vector<4x1xf32>
      %19 = vector.extract_strided_slice %14 {offsets = [0, 1], sizes = [4, 255], strides = [1, 1]} : vector<4x256xf32> to vector<4x255xf32>
      %20 = tpu.concatenate %19, %18 in 1 : vector<4x255xf32>, vector<4x1xf32> -> vector<4x256xf32>
      %21 = tpu.concatenate %17, %14, %20 in 0 : vector<4x256xf32>, vector<4x256xf32>, vector<4x256xf32> -> vector<12x256xf32>
      %22 = vector.extract_strided_slice %12 {offsets = [1, 0, 0], sizes = [1, 4, 256], strides = [1, 1, 1]} : vector<2x4x256xf32> to vector<1x4x256xf32>
      %23 = vector.shape_cast %22 : vector<1x4x256xf32> to vector<4x256xf32>
      %cst_8 = arith.constant 0.000000e+00 : f32
      %24 = vector.broadcast %cst_8 : f32 to vector<4x1xf32>
      %25 = vector.extract_strided_slice %23 {offsets = [0, 0], sizes = [4, 255], strides = [1, 1]} : vector<4x256xf32> to vector<4x255xf32>
      %26 = tpu.concatenate %24, %25 in 1 : vector<4x1xf32>, vector<4x255xf32> -> vector<4x256xf32>
      %cst_9 = arith.constant 0.000000e+00 : f32
      %27 = vector.broadcast %cst_9 : f32 to vector<4x1xf32>
      %28 = vector.extract_strided_slice %23 {offsets = [0, 1], sizes = [4, 255], strides = [1, 1]} : vector<4x256xf32> to vector<4x255xf32>
      %29 = tpu.concatenate %28, %27 in 1 : vector<4x255xf32>, vector<4x1xf32> -> vector<4x256xf32>
      %30 = tpu.concatenate %26, %23, %29 in 0 : vector<4x256xf32>, vector<4x256xf32>, vector<4x256xf32> -> vector<12x256xf32>
      %31 = tpu.concatenate %21, %30 in 1 : vector<12x256xf32>, vector<12x256xf32> -> vector<12x512xf32>
      %c0_10 = arith.constant 0 : index
      %c0_11 = arith.constant 0 : index
      %32 = vector.load %arg3[%c0_10, %c0_11] : memref<8x12xf32, #tpu.memory_space<vmem>>, vector<8x12xf32>
      %cst_12 = arith.constant dense<0.000000e+00> : vector<8x512xf32>
      %33 = tpu.matmul %32, %31, %cst_12 {dimension_numbers = #tpu.dot_dimension_numbers<[1], [0], [0], [1], [0, 0, 1, 1], [], []>} : vector<8x12xf32>, vector<12x512xf32>, vector<8x512xf32> -> vector<8x512xf32>
      %34 = arith.index_cast %arg1 : i32 to index
      %c0_13 = arith.constant 0 : index
      %c0_14 = arith.constant 0 : index
      %35 = vector.load %arg10[%34, %c0_13, %c0_14] : memref<2x8x512xf32, #tpu.memory_space<vmem>>, vector<1x8x512xf32>
      %36 = vector.shape_cast %35 : vector<1x8x512xf32> to vector<8x512xf32>
      %37 = vector.shape_cast %33 : vector<8x512xf32> to vector<1x8x512xf32>
      tpu.vector_store %arg10[%34, %c0_13, %c0_14], %37 {strides = array<i32>} : memref<2x8x512xf32, #tpu.memory_space<vmem>>, vector<1x8x512xf32>,
      %c0_15 = arith.constant 0 : index
      %c0_16 = arith.constant 0 : index
      %38 = vector.load %arg12[%c0_15, %c0_16] : memref<8x2xf32, #tpu.memory_space<vmem>>, vector<8x2xf32>
      %cst_17 = arith.constant dense<0.000000e+00> : vector<8xf32>
      %39 = vector.multi_reduction <add>, %33, %cst_17 [1] : vector<8x512xf32> to vector<8xf32>
      %40 = vector.shape_cast %39 : vector<8xf32> to vector<8x1xf32>
      %41 = arith.mulf %33, %33 : vector<8x512xf32>
      %cst_18 = arith.constant dense<0.000000e+00> : vector<8xf32>
      %42 = vector.multi_reduction <add>, %41, %cst_18 [1] : vector<8x512xf32> to vector<8xf32>
      %43 = vector.shape_cast %42 : vector<8xf32> to vector<8x1xf32>
      %44 = tpu.concatenate %40, %43 in 1 : vector<8x1xf32>, vector<8x1xf32> -> vector<8x2xf32>
      %45 = arith.addf %38, %44 : vector<8x2xf32>
      %c0_19 = arith.constant 0 : index
      %c0_20 = arith.constant 0 : index
      %46 = vector.load %arg12[%c0_19, %c0_20] : memref<8x2xf32, #tpu.memory_space<vmem>>, vector<8x2xf32>
      tpu.vector_store %arg12[%c0_19, %c0_20], %45 {strides = array<i32>} : memref<8x2xf32, #tpu.memory_space<vmem>>, vector<8x2xf32>,
      %c1_i32_21 = arith.constant 1 : i32
      %47 = arith.cmpi eq, %arg1, %c1_i32_21 : i32
      %48 = arith.extui %47 : i1 to i32
      %c0_i32_22 = arith.constant 0 : i32
      %49 = arith.cmpi ne, %48, %c0_i32_22 : i32
      scf.if %49 {
        %c0_23 = arith.constant 0 : index
        %c0_24 = arith.constant 0 : index
        %50 = vector.load %arg12[%c0_23, %c0_24] : memref<8x2xf32, #tpu.memory_space<vmem>>, vector<8x1xf32>
        %cst_25 = arith.constant 1.024000e+03 : f32
        %51 = vector.broadcast %cst_25 : f32 to vector<8x1xf32>
        %52 = arith.divf %50, %51 : vector<8x1xf32>
        %c0_26 = arith.constant 0 : index
        %c1 = arith.constant 1 : index
        %53 = vector.load %arg12[%c0_26, %c1] : memref<8x2xf32, #tpu.memory_space<vmem>>, vector<8x1xf32>
        %cst_27 = arith.constant 1.024000e+03 : f32
        %54 = vector.broadcast %cst_27 : f32 to vector<8x1xf32>
        %55 = arith.divf %53, %54 : vector<8x1xf32>
        %56 = arith.mulf %52, %52 : vector<8x1xf32>
        %57 = arith.subf %55, %56 : vector<8x1xf32>
        %c0_28 = arith.constant 0 : index
        %c0_29 = arith.constant 0 : index
        %58 = vector.load %arg5[%c0_28, %c0_29] : memref<8x1xf32, #tpu.memory_space<vmem>>, vector<8x1xf32>
        %cst_30 = arith.constant 9.99999974E-6 : f32
        %59 = vector.broadcast %cst_30 : f32 to vector<8x1xf32>
        %60 = arith.addf %57, %59 : vector<8x1xf32>
        %61 = math.rsqrt %60 : vector<8x1xf32>
        %62 = arith.mulf %58, %61 : vector<8x1xf32>
        %c0_31 = arith.constant 0 : index
        %c0_32 = arith.constant 0 : index
        %63 = vector.load %arg6[%c0_31, %c0_32] : memref<8x1xf32, #tpu.memory_space<vmem>>, vector<8x1xf32>
        %64 = arith.mulf %52, %62 : vector<8x1xf32>
        %65 = arith.subf %63, %64 : vector<8x1xf32>
        %66 = tpu.concatenate %62, %65 in 1 : vector<8x1xf32>, vector<8x1xf32> -> vector<8x2xf32>
        %c0_33 = arith.constant 0 : index
        %c0_34 = arith.constant 0 : index
        %67 = vector.load %arg12[%c0_33, %c0_34] : memref<8x2xf32, #tpu.memory_space<vmem>>, vector<8x2xf32>
        tpu.vector_store %arg12[%c0_33, %c0_34], %66 {strides = array<i32>} : memref<8x2xf32, #tpu.memory_space<vmem>>, vector<8x2xf32>,
      } else {
      }
    } else {
    }
    %c1_i32 = arith.constant 1 : i32
    %3 = arith.cmpi eq, %arg0, %c1_i32 : i32
    %4 = arith.extui %3 : i1 to i32
    %c0_i32_1 = arith.constant 0 : i32
    %5 = arith.cmpi ne, %4, %c0_i32_1 : i32
    scf.if %5 {
      %c0_i32_3 = arith.constant 0 : i32
      %9 = arith.cmpi eq, %arg1, %c0_i32_3 : i32
      %10 = arith.extui %9 : i1 to i32
      %c0_i32_4 = arith.constant 0 : i32
      %11 = arith.cmpi ne, %10, %c0_i32_4 : i32
      scf.if %11 {
        %cst_27 = arith.constant 0.000000e+00 : f32
        %61 = vector.broadcast %cst_27 : f32 to vector<4x2xf32>
        %c0_28 = arith.constant 0 : index
        %c0_29 = arith.constant 0 : index
        %62 = vector.load %arg13[%c0_28, %c0_29] : memref<4x2xf32, #tpu.memory_space<vmem>>, vector<4x2xf32>
        tpu.vector_store %arg13[%c0_28, %c0_29], %61 {strides = array<i32>} : memref<4x2xf32, #tpu.memory_space<vmem>>, vector<4x2xf32>,
      } else {
      }
      %12 = arith.index_cast %arg1 : i32 to index
      %c0 = arith.constant 0 : index
      %c0_5 = arith.constant 0 : index
      %13 = vector.load %arg10[%12, %c0, %c0_5] : memref<2x8x512xf32, #tpu.memory_space<vmem>>, vector<1x8x512xf32>
      %14 = vector.shape_cast %13 : vector<1x8x512xf32> to vector<8x512xf32>
      %c0_6 = arith.constant 0 : index
      %c0_7 = arith.constant 0 : index
      %15 = vector.load %arg12[%c0_6, %c0_7] : memref<8x2xf32, #tpu.memory_space<vmem>>, vector<8x1xf32>
      %16 = vector.broadcast %15 : vector<8x1xf32> to vector<8x512xf32>
      %17 = arith.mulf %14, %16 : vector<8x512xf32>
      %c0_8 = arith.constant 0 : index
      %c1 = arith.constant 1 : index
      %18 = vector.load %arg12[%c0_8, %c1] : memref<8x2xf32, #tpu.memory_space<vmem>>, vector<8x1xf32>
      %19 = vector.broadcast %18 : vector<8x1xf32> to vector<8x512xf32>
      %20 = arith.addf %17, %19 : vector<8x512xf32>
      %cst = arith.constant 0.000000e+00 : f32
      %21 = vector.broadcast %cst : f32 to vector<8x512xf32>
      %22 = arith.cmpf oge, %20, %21 : vector<8x512xf32>
      %cst_9 = arith.constant 0.00999999977 : f32
      %23 = vector.broadcast %cst_9 : f32 to vector<8x512xf32>
      %24 = arith.mulf %23, %20 : vector<8x512xf32>
      %25 = arith.select %22, %20, %24 : vector<8x512xi1>, vector<8x512xf32>
      %26 = vector.extract_strided_slice %25 {offsets = [0, 0], sizes = [8, 256], strides = [1, 1]} : vector<8x512xf32> to vector<8x256xf32>
      %cst_10 = arith.constant 0.000000e+00 : f32
      %27 = vector.broadcast %cst_10 : f32 to vector<8x1xf32>
      %28 = vector.extract_strided_slice %26 {offsets = [0, 0], sizes = [8, 255], strides = [1, 1]} : vector<8x256xf32> to vector<8x255xf32>
      %29 = tpu.concatenate %27, %28 in 1 : vector<8x1xf32>, vector<8x255xf32> -> vector<8x256xf32>
      %cst_11 = arith.constant 0.000000e+00 : f32
      %30 = vector.broadcast %cst_11 : f32 to vector<8x1xf32>
      %31 = vector.extract_strided_slice %26 {offsets = [0, 1], sizes = [8, 255], strides = [1, 1]} : vector<8x256xf32> to vector<8x255xf32>
      %32 = tpu.concatenate %31, %30 in 1 : vector<8x255xf32>, vector<8x1xf32> -> vector<8x256xf32>
      %33 = tpu.concatenate %29, %26, %32 in 0 : vector<8x256xf32>, vector<8x256xf32>, vector<8x256xf32> -> vector<24x256xf32>
      %34 = vector.extract_strided_slice %25 {offsets = [0, 256], sizes = [8, 256], strides = [1, 1]} : vector<8x512xf32> to vector<8x256xf32>
      %cst_12 = arith.constant 0.000000e+00 : f32
      %35 = vector.broadcast %cst_12 : f32 to vector<8x1xf32>
      %36 = vector.extract_strided_slice %34 {offsets = [0, 0], sizes = [8, 255], strides = [1, 1]} : vector<8x256xf32> to vector<8x255xf32>
      %37 = tpu.concatenate %35, %36 in 1 : vector<8x1xf32>, vector<8x255xf32> -> vector<8x256xf32>
      %cst_13 = arith.constant 0.000000e+00 : f32
      %38 = vector.broadcast %cst_13 : f32 to vector<8x1xf32>
      %39 = vector.extract_strided_slice %34 {offsets = [0, 1], sizes = [8, 255], strides = [1, 1]} : vector<8x256xf32> to vector<8x255xf32>
      %40 = tpu.concatenate %39, %38 in 1 : vector<8x255xf32>, vector<8x1xf32> -> vector<8x256xf32>
      %41 = tpu.concatenate %37, %34, %40 in 0 : vector<8x256xf32>, vector<8x256xf32>, vector<8x256xf32> -> vector<24x256xf32>
      %42 = tpu.concatenate %33, %41 in 1 : vector<24x256xf32>, vector<24x256xf32> -> vector<24x512xf32>
      %c0_14 = arith.constant 0 : index
      %c0_15 = arith.constant 0 : index
      %43 = vector.load %arg4[%c0_14, %c0_15] : memref<4x24xf32, #tpu.memory_space<vmem>>, vector<4x24xf32>
      %cst_16 = arith.constant dense<0.000000e+00> : vector<4x512xf32>
      %44 = tpu.matmul %43, %42, %cst_16 {dimension_numbers = #tpu.dot_dimension_numbers<[1], [0], [0], [1], [0, 0, 1, 1], [], []>} : vector<4x24xf32>, vector<24x512xf32>, vector<4x512xf32> -> vector<4x512xf32>
      %45 = arith.index_cast %arg1 : i32 to index
      %c0_17 = arith.constant 0 : index
      %c0_18 = arith.constant 0 : index
      %46 = vector.load %arg11[%45, %c0_17, %c0_18] : memref<2x4x512xf32, #tpu.memory_space<vmem>>, vector<1x4x512xf32>
      %47 = vector.shape_cast %46 : vector<1x4x512xf32> to vector<4x512xf32>
      %48 = vector.shape_cast %44 : vector<4x512xf32> to vector<1x4x512xf32>
      tpu.vector_store %arg11[%45, %c0_17, %c0_18], %48 {strides = array<i32>} : memref<2x4x512xf32, #tpu.memory_space<vmem>>, vector<1x4x512xf32>,
      %c0_19 = arith.constant 0 : index
      %c0_20 = arith.constant 0 : index
      %49 = vector.load %arg13[%c0_19, %c0_20] : memref<4x2xf32, #tpu.memory_space<vmem>>, vector<4x2xf32>
      %cst_21 = arith.constant dense<0.000000e+00> : vector<4xf32>
      %50 = vector.multi_reduction <add>, %44, %cst_21 [1] : vector<4x512xf32> to vector<4xf32>
      %51 = vector.shape_cast %50 : vector<4xf32> to vector<4x1xf32>
      %52 = arith.mulf %44, %44 : vector<4x512xf32>
      %cst_22 = arith.constant dense<0.000000e+00> : vector<4xf32>
      %53 = vector.multi_reduction <add>, %52, %cst_22 [1] : vector<4x512xf32> to vector<4xf32>
      %54 = vector.shape_cast %53 : vector<4xf32> to vector<4x1xf32>
      %55 = tpu.concatenate %51, %54 in 1 : vector<4x1xf32>, vector<4x1xf32> -> vector<4x2xf32>
      %56 = arith.addf %49, %55 : vector<4x2xf32>
      %c0_23 = arith.constant 0 : index
      %c0_24 = arith.constant 0 : index
      %57 = vector.load %arg13[%c0_23, %c0_24] : memref<4x2xf32, #tpu.memory_space<vmem>>, vector<4x2xf32>
      tpu.vector_store %arg13[%c0_23, %c0_24], %56 {strides = array<i32>} : memref<4x2xf32, #tpu.memory_space<vmem>>, vector<4x2xf32>,
      %c1_i32_25 = arith.constant 1 : i32
      %58 = arith.cmpi eq, %arg1, %c1_i32_25 : i32
      %59 = arith.extui %58 : i1 to i32
      %c0_i32_26 = arith.constant 0 : i32
      %60 = arith.cmpi ne, %59, %c0_i32_26 : i32
      scf.if %60 {
        %c0_27 = arith.constant 0 : index
        %c0_28 = arith.constant 0 : index
        %61 = vector.load %arg13[%c0_27, %c0_28] : memref<4x2xf32, #tpu.memory_space<vmem>>, vector<4x1xf32>
        %cst_29 = arith.constant 1.024000e+03 : f32
        %62 = vector.broadcast %cst_29 : f32 to vector<4x1xf32>
        %63 = arith.divf %61, %62 : vector<4x1xf32>
        %c0_30 = arith.constant 0 : index
        %c1_31 = arith.constant 1 : index
        %64 = vector.load %arg13[%c0_30, %c1_31] : memref<4x2xf32, #tpu.memory_space<vmem>>, vector<4x1xf32>
        %cst_32 = arith.constant 1.024000e+03 : f32
        %65 = vector.broadcast %cst_32 : f32 to vector<4x1xf32>
        %66 = arith.divf %64, %65 : vector<4x1xf32>
        %67 = arith.mulf %63, %63 : vector<4x1xf32>
        %68 = arith.subf %66, %67 : vector<4x1xf32>
        %c0_33 = arith.constant 0 : index
        %c0_34 = arith.constant 0 : index
        %69 = vector.load %arg7[%c0_33, %c0_34] : memref<4x1xf32, #tpu.memory_space<vmem>>, vector<4x1xf32>
        %cst_35 = arith.constant 9.99999974E-6 : f32
        %70 = vector.broadcast %cst_35 : f32 to vector<4x1xf32>
        %71 = arith.addf %68, %70 : vector<4x1xf32>
        %72 = math.rsqrt %71 : vector<4x1xf32>
        %73 = arith.mulf %69, %72 : vector<4x1xf32>
        %c0_36 = arith.constant 0 : index
        %c0_37 = arith.constant 0 : index
        %74 = vector.load %arg8[%c0_36, %c0_37] : memref<4x1xf32, #tpu.memory_space<vmem>>, vector<4x1xf32>
        %75 = arith.mulf %63, %73 : vector<4x1xf32>
        %76 = arith.subf %74, %75 : vector<4x1xf32>
        %77 = tpu.concatenate %73, %76 in 1 : vector<4x1xf32>, vector<4x1xf32> -> vector<4x2xf32>
        %c0_38 = arith.constant 0 : index
        %c0_39 = arith.constant 0 : index
        %78 = vector.load %arg13[%c0_38, %c0_39] : memref<4x2xf32, #tpu.memory_space<vmem>>, vector<4x2xf32>
        tpu.vector_store %arg13[%c0_38, %c0_39], %77 {strides = array<i32>} : memref<4x2xf32, #tpu.memory_space<vmem>>, vector<4x2xf32>,
      } else {
      }
    } else {
    }
    %c2_i32 = arith.constant 2 : i32
    %6 = arith.cmpi eq, %arg0, %c2_i32 : i32
    %7 = arith.extui %6 : i1 to i32
    %c0_i32_2 = arith.constant 0 : i32
    %8 = arith.cmpi ne, %7, %c0_i32_2 : i32
    scf.if %8 {
      %9 = arith.index_cast %arg1 : i32 to index
      %c0 = arith.constant 0 : index
      %c0_3 = arith.constant 0 : index
      %10 = vector.load %arg11[%9, %c0, %c0_3] : memref<2x4x512xf32, #tpu.memory_space<vmem>>, vector<1x4x512xf32>
      %11 = vector.shape_cast %10 : vector<1x4x512xf32> to vector<4x512xf32>
      %c0_4 = arith.constant 0 : index
      %c0_5 = arith.constant 0 : index
      %12 = vector.load %arg13[%c0_4, %c0_5] : memref<4x2xf32, #tpu.memory_space<vmem>>, vector<4x1xf32>
      %13 = vector.broadcast %12 : vector<4x1xf32> to vector<4x512xf32>
      %14 = arith.mulf %11, %13 : vector<4x512xf32>
      %c0_6 = arith.constant 0 : index
      %c1 = arith.constant 1 : index
      %15 = vector.load %arg13[%c0_6, %c1] : memref<4x2xf32, #tpu.memory_space<vmem>>, vector<4x1xf32>
      %16 = vector.broadcast %15 : vector<4x1xf32> to vector<4x512xf32>
      %17 = arith.addf %14, %16 : vector<4x512xf32>
      %cst = arith.constant 0.000000e+00 : f32
      %18 = vector.broadcast %cst : f32 to vector<4x512xf32>
      %19 = arith.cmpf oge, %17, %18 : vector<4x512xf32>
      %cst_7 = arith.constant 0.00999999977 : f32
      %20 = vector.broadcast %cst_7 : f32 to vector<4x512xf32>
      %21 = arith.mulf %20, %17 : vector<4x512xf32>
      %22 = arith.select %19, %17, %21 : vector<4x512xi1>, vector<4x512xf32>
      %23 = vector.extract_strided_slice %22 {offsets = [0, 0], sizes = [4, 256], strides = [1, 1]} : vector<4x512xf32> to vector<4x256xf32>
      %c0_8 = arith.constant 0 : index
      %c0_9 = arith.constant 0 : index
      %c0_10 = arith.constant 0 : index
      %24 = vector.load %arg9[%c0_8, %c0_9, %c0_10] : memref<2x4x256xf32, #tpu.memory_space<vmem>>, vector<1x4x256xf32>
      %25 = vector.shape_cast %24 : vector<1x4x256xf32> to vector<4x256xf32>
      %26 = vector.shape_cast %23 : vector<4x256xf32> to vector<1x4x256xf32>
      tpu.vector_store %arg9[%c0_8, %c0_9, %c0_10], %26 {strides = array<i32>} : memref<2x4x256xf32, #tpu.memory_space<vmem>>, vector<1x4x256xf32>,
      %27 = vector.extract_strided_slice %22 {offsets = [0, 256], sizes = [4, 256], strides = [1, 1]} : vector<4x512xf32> to vector<4x256xf32>
      %c1_11 = arith.constant 1 : index
      %c0_12 = arith.constant 0 : index
      %c0_13 = arith.constant 0 : index
      %28 = vector.load %arg9[%c1_11, %c0_12, %c0_13] : memref<2x4x256xf32, #tpu.memory_space<vmem>>, vector<1x4x256xf32>
      %29 = vector.shape_cast %28 : vector<1x4x256xf32> to vector<4x256xf32>
      %30 = vector.shape_cast %27 : vector<4x256xf32> to vector<1x4x256xf32>
      tpu.vector_store %arg9[%c1_11, %c0_12, %c0_13], %30 {strides = array<i32>} : memref<2x4x256xf32, #tpu.memory_space<vmem>>, vector<1x4x256xf32>,
    } else {
    }
    return
  }
  func.func @transform_0(%arg0: i32, %arg1: i32) -> (i32, i32, i32) {
    %c0_i32 = arith.constant 0 : i32
    %0 = arith.cmpi eq, %arg0, %c0_i32 : i32
    %c0_i32_0 = arith.constant 0 : i32
    %1 = arith.select %0, %arg1, %c0_i32_0 : i32
    %c0_i32_1 = arith.constant 0 : i32
    %c0_i32_2 = arith.constant 0 : i32
    %c0_i32_3 = arith.constant 0 : i32
    return %1, %c0_i32_1, %c0_i32_2 : i32, i32, i32
  }
  func.func @transform_1(%arg0: i32, %arg1: i32) -> (i32, i32) {
    %c0_i32 = arith.constant 0 : i32
    %c0_i32_0 = arith.constant 0 : i32
    %c0_i32_1 = arith.constant 0 : i32
    return %c0_i32, %c0_i32_0 : i32, i32
  }
  func.func @transform_2(%arg0: i32, %arg1: i32) -> (i32, i32) {
    %c0_i32 = arith.constant 0 : i32
    %c0_i32_0 = arith.constant 0 : i32
    %c0_i32_1 = arith.constant 0 : i32
    return %c0_i32, %c0_i32_0 : i32, i32
  }
  func.func @transform_3(%arg0: i32, %arg1: i32) -> (i32, i32) {
    %c0_i32 = arith.constant 0 : i32
    %c0_i32_0 = arith.constant 0 : i32
    %c0_i32_1 = arith.constant 0 : i32
    return %c0_i32, %c0_i32_0 : i32, i32
  }
  func.func @transform_4(%arg0: i32, %arg1: i32) -> (i32, i32) {
    %c0_i32 = arith.constant 0 : i32
    %c0_i32_0 = arith.constant 0 : i32
    %c0_i32_1 = arith.constant 0 : i32
    return %c0_i32, %c0_i32_0 : i32, i32
  }
  func.func @transform_5(%arg0: i32, %arg1: i32) -> (i32, i32) {
    %c0_i32 = arith.constant 0 : i32
    %c0_i32_0 = arith.constant 0 : i32
    %c0_i32_1 = arith.constant 0 : i32
    return %c0_i32, %c0_i32_0 : i32, i32
  }
  func.func @transform_6(%arg0: i32, %arg1: i32) -> (i32, i32) {
    %c0_i32 = arith.constant 0 : i32
    %c0_i32_0 = arith.constant 0 : i32
    %c0_i32_1 = arith.constant 0 : i32
    return %c0_i32, %c0_i32_0 : i32, i32
  }
  func.func @transform_7(%arg0: i32, %arg1: i32) -> (i32, i32, i32) {
    %c2_i32 = arith.constant 2 : i32
    %0 = arith.cmpi eq, %arg0, %c2_i32 : i32
    %c0_i32 = arith.constant 0 : i32
    %1 = arith.select %0, %arg1, %c0_i32 : i32
    %c0_i32_0 = arith.constant 0 : i32
    %c0_i32_1 = arith.constant 0 : i32
    %c0_i32_2 = arith.constant 0 : i32
    return %1, %c0_i32_0, %c0_i32_1 : i32, i32, i32
  }
}

</mosaic_0001>

<bundles_post_ra>
// kernel: vgg_block_pallas.1
= control target key start
LH: loop header
LB: loop body
LE: loop exit
PB: predicated region body
PF: predicated region fallthrough
CT: control target
= control target key end

     0   :  { %12 = vsyncpa [#allocation7], 0  ;;  %s1612_s0 = inlined_call_operand.vmem [shape: f32[4,4,256], index: 0, kind: input, shape index: {}]   ;;  %s1613_s1 = inlined_call_operand.vmem [shape: f32[8,12], index: 1, kind: input, shape index: {}]   ;;  %s1614_s2 = inlined_call_operand.vmem [shape: f32[4,24], index: 2, kind: input, shape index: {}]   ;;  %s1615_s3 = inlined_call_operand.vmem [shape: f32[8,1], index: 3, kind: input, shape index: {}]   ;;  %s1616_s4 = inlined_call_operand.vmem [shape: f32[8,1], index: 4, kind: input, shape index: {}]   ;;  %s1617_s5 = inlined_call_operand.vmem [shape: f32[4,1], index: 5, kind: input, shape index: {}]   ;;  %s1618_s6 = inlined_call_operand.vmem [shape: f32[4,1], index: 6, kind: input, shape index: {}]   ;;  %s1619_s7 = inlined_call_operand.hbm [shape: f32[4,4,256], index: 7, kind: output, shape index: {}]  }
   0x1   :  { %14 = vsyncpa [#allocation7 + $0x1], 0  ;;  %s1396_s24 = smov 0   ;;  %s1398_s25 = smov 0  }
   0x2   :  { %s1400_s26 = smov 0   ;;  %s1402_s27 = smov 0  }
   0x3   :  { %s1404_s28 = smov 0   ;;  %s1406_s29 = smov 0  }
   0x4   :  { %s1408_s30 = smov 0   ;;  %s1410_s8 = smov 0  }
   0x5 LB: > { %s1031_s9 = sadd.s32 4294967295, %s1332_s8   ;;  %s29_s10 = sadd.s32 1, %s1324_s29  ;;  %s1332_s8 = sphi %s1410_s8, %s20_s8   ;;  %s1328_s30 = sphi %s1408_s30, %s1630_s30   ;;  %s1324_s29 = sphi %s1406_s29, %s1629_s29   ;;  %s1320_s28 = sphi %s1404_s28, %s1628_s28   ;;  %s1316_s27 = sphi %s1402_s27, %s1627_s27   ;;  %s1312_s26 = sphi %s1400_s26, %s1626_s26   ;;  %s1308_s25 = sphi %s1398_s25, %s1625_s25   ;;  %s1304_s24 = sphi %s1396_s24, %s1624_s24  }
   0x6   : > { %s32_s11 = sadd.s32 1, %s1328_s30  ;;  %p30_p0 = scmp.ge.s32.totalorder %s29_s10, 2 }
   0x7   : > { %p192_p1 = scmp.eq.s32.totalorder %s1328_s30, 2  ;;  %s1032_s12 = sadd.s32 4294967294, %s1332_s8  }
   0x8   : > { %p209_p2 = scmp.ne.s32.totalorder %s1312_s26, %s1308_s25  ;;  %s1632_s10 = smov (%p30_p0, %s29_s10), 0 }
   0x9   : > { %s1634_s11 = smov (!%p30_p0, %s32_s11), %s1328_s30  ;;  %p210_p4 = scmp.eq.s32.totalorder %s1031_s9, 5 }
   0xa   : > { %s193_s13 = scalar_select %p192_p1, %s1324_s29, 0 }
   0xb   : > { %p34_p3 = scmp.ge.s32.totalorder %s1634_s11, 3  ;;  %p215_p5 = scmp.ne.s32.totalorder %s1308_s25, %s1304_s24 }
   0xc   : > { %p216_p6 = scmp.eq.s32.totalorder %s1032_s12, 5  ;;  %p1451_p7 = por %p210_p4, %p209_p2 }
   0xd   : > { %s1636_s11 = smov (%p34_p3, %s1634_s11), 0  ;;  %p1035_p10 = scmp.ge.s32.totalorder %s1332_s8, 1 }
   0xe   : > { %p1455_p8 = por %p216_p6, %p215_p5  ;;  %p194_p9 = scmp.eq.s32.totalorder %s1636_s11, 2 }
   0xf   : > { %p266_p11 = scmp.lt.s32.totalorder %s1332_s8, 7  ;;  %s199_s18 = sadd.s32 1, %s1312_s26 }
  0x10   : > { %s195_s16 = scalar_select %p194_p9, %s1632_s10, 0 }
  0x11   : > { %p267_p12 = pnand %p1035_p10, %p266_p11 }
  0x12   : > { %s196_s17 = ssub.s32 %s193_s13, %s195_s16  ;;  %s298_s20 = sand.u32 (!%p267_p12), 1, %s1308_s25  }
  0x13   : > { %p197_p13 = scmp.eq.s32.totalorder %s196_s17, 0  ;;  %270 = sbr.rel (%p267_p12) target bundleno = 2128 (0x850), region = 48 }
  0x14   : > { %p301_p0 = scmp.eq.s32.totalorder (!%p267_p12), %s1320_s28, 0  ;;  %s1036_s21 = sshll.u32 (!%p267_p12), %s298_s20, 4 }
  0x15   : > { %s1465_s19 = scalar_select %p197_p13, %s1312_s26, %s199_s18  }
  0x16   : > { %s1475_s17 = scalar_lea.vmem (!%p267_p12), [#allocation6], %s1036_s21  ;;  %p1040_p2 = scmp.ne.s32.totalorder (!%p267_p12), %s1320_s28, 0 }
  0x1a   : > { %s302_s22 = scalar_select %p301_p0, %s1316_s27, 0 }
  0x1b   : > { %318 = sbr.rel (%p1040_p2) target bundleno = 920 (0x398), region = 52  ;;  %p1041_p3 = scmp.ne.s32.totalorder (!%p1040_p2), %s1316_s27, 0 }
  0x1c   : > { %s1037_s23 = sshll.u32 %s302_s22, 1 }
  0x1d   : > { %p304_p1 = scmp.lt.s32.totalorder %s1037_s23, 3 }
  0x1f   : > { %s1638_s23 = smov (!%p304_p1, %s1037_s23), 3 }
  0x20   : > { %s1075_s9 = sshll.u32 %s1638_s23, 3 }
  0x21   : > { %s308_s16 = scalar_lea.vmem %s1612_s0, %s1075_s9 }
  0x22   : > { %322 = sbr.rel (%p1041_p3) target bundleno = 41 (0x29), region = 56  ;;  %vm323_vm0 = vcmask (!%p1041_p3), 15360   ;;  %v1334_v0 = vmov (!%p1041_p3), 0.0  }
  0x23   : > { %324 = vst.msk [vmem:[#allocation4] sm:$0xff] (!%p1041_p3), %vm323_vm0, %v1334_v0 }
  0x29 PF: > { %v326_v1 = vld [vmem:[%s308_s16 + $0x8] sm:$0xff]  ;;  %v325_v2 = vld [vmem:[%s308_s16] sm:$0xff]  ;;  %v1335_v7 = vmov 0.0   ;;  %s1336_s18 = smov 1   ;;  %s1337_s21 = smov 127   ;;  %vm333_vm1 = vcmask 7168  }
  0x2a   : > { %v352_v3 = vcombine.high %v326_v1, %v326_v1  ;;  %v328_v4 = vcombine.high %v325_v2, %v325_v2  ;;  %451 = vmatprep.mubr.f32.mxu0 %v1335_v7  ;;  %522 = vmatprep.mubr.f32.mxu1 %v1335_v7  ;;  %v368_v12 = vcombine.low %v326_v1, %v326_v1  ;;  %vm348_vm2 = vcmask 1043456   ;;  %v372_v40 = vld [vmem:[%s1613_s1] sm:$0xff]  ;;  %s1076_s9 = sshll.u32 %s1316_s27, 5  ;;  %p1050_p4 = scmp.ne.s32.totalorder %s1316_s27, 1 }
  0x2b   : > { %v346_v17 = vcombine.low %v325_v2, %v325_v2  ;;  %vm342_vm3 = vcmask 1039360   ;;  %vm1338_vm4 = vmmov 1   ;;  %vm373_vm6 = vcmask 97280   ;;  %s531_s12 = scalar_lea.vmem [#allocation2], %s1076_s9  ;;  %v536_v55 = vld [vmem:[#allocation4] sm:$0xff]  ;;  %s1339_s13 = smov (!%p1050_p4), 1  }
  0x2c   : > { %v1206_v5 = vpack.i.bf16 %v352_v3, %v326_v1  ;;  %v1196_v6 = vpack.i.bf16 %v328_v4, %v325_v2  ;;  %v1211_v8 = vpack.i.bf16 %v326_v1, %v352_v3  ;;  %v1201_v9 = vpack.i.bf16 %v325_v2, %v328_v4  ;;  %vm1083_vm5 = vmpackc.low %vm348_vm2, %vm1338_vm4  ;;  %s1340_s16 = smov (!%p1050_p4), 127   ;;  %v568_v3 = vld [vmem:[%s1615_s3] sm:$0xff] (!%p1050_p4) }
  0x2d   : > { %vm553_vm7 = vcmask 15360  }
  0x2e   : > { %1207 = vrot.lane.b32.xlu1 %v1206_v5, %s1336_s18  ;;  %1197 = vrot.lane.b32.xlu0 %v1196_v6, %s1336_s18  ;;  %v576_v6 = vld [vmem:[%s1616_s4] sm:$0xff] (!%p1050_p4) }
  0x32   : > { %1212 = vrot.lane.b32.xlu1 %v1211_v8, %s1337_s21  ;;  %1202 = vrot.lane.b32.xlu0 %v1201_v9, %s1337_s21 }
  0xa0   : > { %v1208_v10 = vpop.permute.xlu1 %1207  ;;  %v1198_v11 = vpop.permute.xlu0 %1197 }
  0xa1   : > { %v1210_v13 = vunpack.i.h.bf16 %v1208_v10  ;;  %v1209_v14 = vunpack.i.l.bf16 %v1208_v10  ;;  %v1200_v15 = vunpack.i.h.bf16 %v1198_v11  ;;  %v1199_v16 = vunpack.i.l.bf16 %v1198_v11 }
  0xa3   : > { %v360_v18 = vsel %vm333_vm1, 0.0, %v1209_v14  ;;  %v337_v19 = vsel %vm333_vm1, 0.0, %v1199_v16  ;;  %v334_v20 = vsel %vm333_vm1, %v1199_v16, %v1200_v15  ;;  %v357_v21 = vsel %vm333_vm1, %v1209_v14, %v1210_v13 }
  0xa4   : > { %v1213_v22 = vpop.permute.xlu1 %1212  ;;  %v1203_v23 = vpop.permute.xlu0 %1202  ;;  %v371_v24 = vsel %vm348_vm2, %v357_v21, %v326_v1  ;;  %v370_v25 = vsel %vm348_vm2, %v360_v18, %v368_v12  ;;  %v350_v30 = vsel %vm348_vm2, %v334_v20, %v325_v2  ;;  %v349_v31 = vsel %vm348_vm2, %v337_v19, %v346_v17 }
  0xa5   : > { %v1215_v26 = vunpack.i.h.bf16 %v1213_v22  ;;  %v1214_v27 = vunpack.i.l.bf16 %v1213_v22  ;;  %v1205_v28 = vunpack.i.h.bf16 %v1203_v23  ;;  %v1204_v29 = vunpack.i.l.bf16 %v1203_v23 }
  0xa7   : > { %v345_v32 = vsel %vm342_vm3, %v1204_v29, 0.0  ;;  %v367_v33 = vsel %vm342_vm3, %v1214_v27, 0.0  ;;  %v343_v34 = vsel %vm342_vm3, %v1205_v28, %v1204_v29  ;;  %v365_v35 = vsel %vm342_vm3, %v1215_v26, %v1214_v27 }
  0xa8   : > { %v1082_v36 = vpack.c.bf16 %v345_v32, %v350_v30  ;;  %v1088_v37 = vpack.c.bf16 %v367_v33, %v371_v24  ;;  %v1085_v38 = vpack.c.bf16 %v343_v34, %v349_v31  ;;  %v1091_v39 = vpack.c.bf16 %v365_v35, %v370_v25 }
  0xaa   : > { %1084 = vmatprep.subr.msk.bf16.mxu0 %vm1083_vm5, %v1082_v36  ;;  %1090 = vmatprep.subr.msk.bf16.mxu1 %vm1083_vm5, %v1088_v37 }
  0xab   : > { %1087 = vmatpush1.bf16.msk.msra.mxu0 %vm1083_vm5, %v1085_v38  ;;  %1093 = vmatpush1.bf16.msk.msra.mxu1 %vm1083_vm5, %v1091_v39 }
  0xae   : > { %1044 = vmatmul.mubr.msk.f32.vlgmr.msra.gmra.mrb[0].mxu0 %vm373_vm6, %v372_v40  ;;  %1047 = vmatmul.mubr.msk.f32.vlgmr.msra.gmra.mrb[0].mxu1 %vm373_vm6, %v372_v40 }
 0x181   : > { %v453_v41 = vpop.f32.mrb[0].mxu0  ;;  %v524_v42 = vpop.f32.mrb[0].mxu1 }
 0x182   : > { %532 = vst [vmem:[%s531_s12] sm:$0xff] %v453_v41  ;;  %v542_v43 = vmul.f32 %v453_v41, %v453_v41  ;;  %v455_v44 = vpop.f32.mrb[1].mxu0  ;;  %534 = vst [vmem:[%s531_s12 + $0x10] sm:$0xff] %v524_v42  ;;  %v526_v45 = vpop.f32.mrb[1].mxu1  ;;  %v544_v48 = vmul.f32 %v524_v42, %v524_v42 }
 0x183   : > { %533 = vst [vmem:[%s531_s12 + $0x8] sm:$0xff] %v455_v44  ;;  %v537_v46 = vadd.f32 %v455_v44, %v453_v41  ;;  %v543_v47 = vmul.f32 %v455_v44, %v455_v44  ;;  %535 = vst [vmem:[%s531_s12 + $0x18] sm:$0xff] %v526_v45  ;;  %v545_v51 = vmul.f32 %v526_v45, %v526_v45 }
 0x185   : > { %v546_v49 = vadd.f32 %v543_v47, %v542_v43  ;;  %v538_v50 = vadd.f32 %v537_v46, %v524_v42 }
 0x187   : > { %v539_v52 = vadd.f32 %v538_v50, %v526_v45  ;;  %v547_v53 = vadd.f32 %v546_v49, %v544_v48 }
 0x189   : > { %540 = vadd.xlane.f32.xlu0 %v539_v52  ;;  %v548_v54 = vadd.f32 %v547_v53, %v545_v51 }
 0x18b   : > { %549 = vadd.xlane.f32.xlu1 %v548_v54 }
 0x216   : > { %v541_v56 = vpop.xlane.xlu0 %540  ;;  %558 = sbr.rel (%p1050_p4) target bundleno = 920 (0x398), region = 60 }
 0x218   : > { %v550_v57 = vpop.xlane.xlu1 %549 }
 0x219   : > { %v551_v58 = vsel %vm333_vm1, %v541_v56, %v550_v57 }
 0x21a   : > { %v552_v59 = vadd.f32 %v551_v58, %v536_v55 }
 0x21c   : > { %554 = vst.msk [vmem:[#allocation4] sm:$0xff] %vm553_vm7, %v552_v59 }
 0x223   : > { %v559_v60 = vld [vmem:[#allocation4] sm:$0xff] }
 0x224   : > { %v561_v61 = vmul.f32 0.0009765625, %v559_v60 }
 0x226   : > { %v562_v62 = vmul.f32 %v561_v61, %v561_v61 }
 0x228   : > { %564 = vrot.lane.b32.xlu0 %v562_v62, %s1339_s13 }
 0x29a   : > { %v565_v63 = vpop.permute.xlu0 %564 }
 0x29b   : > { %v567_v0 = vsub.f32 %v561_v61, %v565_v63 }
 0x29d   : > { %v569_v1 = vadd.f32 1e-05, %v567_v0 }
 0x29f   : > { %1220 = vrsqrt.f32 %v569_v1 }
 0x2a9   : > { %v1221_v2 = vpop.eup %1220 }
 0x2aa   : > { %572 = vrot.lane.b32.xlu0 %v1221_v2, %s1340_s16 }
 0x31c   : > { %v573_v4 = vpop.permute.xlu0 %572 }
 0x31d   : > { %v575_v5 = vmul.f32 %v573_v4, %v568_v3 }
 0x31f   : > { %v577_v7 = vmul.f32 %v575_v5, %v561_v61 }
 0x321   : > { %v578_v8 = vsub.f32 %v576_v6, %v577_v7 }
 0x323   : > { %580 = vrot.lane.b32.xlu1 %v578_v8, %s1339_s13 }
 0x395   : > { %v581_v9 = vpop.permute.xlu1 %580 }
 0x396   : > { %v583_v10 = vsel %vm333_vm1, %v575_v5, %v581_v9 }
 0x397   : > { %584 = vst.msk [vmem:[#allocation4] sm:$0xff] %vm553_vm7, %v583_v10 }
 0x398 PF: > { %p1051_p5 = scmp.ne.s32.totalorder %s1320_s28, 1 }
 0x399   : > { %p1052_p6 = scmp.ne.s32.totalorder (!%p1051_p5), %s1316_s27, 0 }
 0x39a   : > { %588 = sbr.rel (%p1051_p5) target bundleno = 1953 (0x7a1), region = 64 }
 0x3a1   : > { %592 = sbr.rel (%p1052_p6) target bundleno = 936 (0x3a8), region = 68  ;;  %vm593_vm8 = vcmask (!%p1052_p6), 11264   ;;  %v1341_v11 = vmov (!%p1052_p6), 0.0  }
 0x3a2   : > { %594 = vst.msk [vmem:[#allocation5] sm:$0xf] (!%p1052_p6), %vm593_vm8, %v1341_v11 }
 0x3a8 PF: > { %v602_v12 = vld [vmem:[#allocation4] sm:$0xff]  ;;  %v1342_v13 = vmov 0   ;;  %v1343_v14 = vmov 1   ;;  %s1077_s9 = sshll.u32 %s1316_s27, 5  ;;  %s1344_s13 = smov 127   ;;  %v1345_v35 = vmov 0.0  }
 0x3a9   : > { %1222 = vset.pattern.permute.xlu0 %v1342_v13  ;;  %s597_s12 = scalar_lea.vmem [#allocation2], %s1077_s9  ;;  %739 = vmatprep.mubr.f32.mxu0 %v1345_v35  ;;  %s1346_s16 = smov 1   ;;  %vm638_vm13 = vcmask 7168   ;;  %vm1347_vm15 = vmmov 1   ;;  %vm647_vm1 = vcmask 1039360   ;;  %vm671_vm2 = vcmask 195584  }
 0x3aa   : > { %605 = vperm.xlu0 %1222, %v602_v12   ;;  %v598_v16 = vld [vmem:[%s597_s12] sm:$0xff]  ;;  %v599_v17 = vld [vmem:[%s597_s12 + $0x8] sm:$0xff]  ;;  %v600_v18 = vld [vmem:[%s597_s12 + $0x10] sm:$0xff]  ;;  %810 = vmatprep.mubr.f32.mxu1 %v1345_v35  ;;  %vm830_vm3 = vcmask 1043456   ;;  %s1078_s22 = sshll.u32 %s1316_s27, 4  ;;  %vm855_vm4 = vcmask 11264  }
 0x3ab   : > { %v601_v19 = vld [vmem:[%s597_s12 + $0x18] sm:$0xff]  ;;  %vm1055_vm14 = vmneg %vm638_vm13  ;;  %v670_v56 = vld [vmem:[%s1614_s2] sm:$0xf]  ;;  %s826_s23 = scalar_lea.vmem [#allocation3], %s1078_s22  ;;  %p1064_p9 = scmp.ne.s32.totalorder %s1316_s27, 1 }
 0x3ac   : > { %vm1508_vm0 = vmpackc.low %vm1347_vm15, %vm1055_vm14  ;;  %s1348_s9 = smov (!%p1064_p9), 1   ;;  %s1349_s12 = smov (!%p1064_p9), 127   ;;  %v878_v35 = vld [vmem:[%s1618_s6] sm:$0xf] (!%p1064_p9) }
 0x3ae   : > { %1223 = vset.pattern.permute.xlu0 %v1343_v14 }
 0x3af   : > { %613 = vperm.xlu0 %1223, %v602_v12  }
 0x429   : > { %v606_v15 = vpop.permute.xlu0 %605 }
 0x42a   : > { %v608_v20 = vmul.f32 %v606_v15, %v598_v16  ;;  %v609_v21 = vmul.f32 %v606_v15, %v599_v17  ;;  %v610_v22 = vmul.f32 %v606_v15, %v600_v18  ;;  %v611_v23 = vmul.f32 %v606_v15, %v601_v19 }
 0x42e   : > { %v614_v24 = vpop.permute.xlu0 %613 }
 0x42f   : > { %v616_v25 = vadd.f32 %v614_v24, %v608_v20  ;;  %v617_v26 = vadd.f32 %v614_v24, %v609_v21  ;;  %v618_v27 = vadd.f32 %v614_v24, %v610_v22  ;;  %v619_v28 = vadd.f32 %v614_v24, %v611_v23  ;;  %v829_v20 = vld [vmem:[#allocation5] sm:$0xf] }
 0x431   : > { %vm621_vm9 = vcmp.ge.f32.partialorder %v617_v26, 0.0  ;;  %v625_v29 = vmul.f32 0.01, %v617_v26  ;;  %vm620_vm10 = vcmp.ge.f32.partialorder %v616_v25, 0.0  ;;  %v626_v30 = vmul.f32 0.01, %v618_v27 }
 0x432   : > { %v624_v31 = vmul.f32 0.01, %v616_v25  ;;  %v627_v32 = vmul.f32 0.01, %v619_v28  ;;  %vm623_vm11 = vcmp.ge.f32.partialorder %v619_v28, 0.0  ;;  %vm622_vm12 = vcmp.ge.f32.partialorder %v618_v27, 0.0 }
 0x433   : > { %v629_v33 = vsel %vm621_vm9, %v617_v26, %v625_v29  ;;  %v630_v38 = vsel %vm622_vm12, %v618_v27, %v626_v30 }
 0x434   : > { %645 = vrot.lane.b32.xlu0 %v629_v33, %s1344_s13  ;;  %v628_v34 = vsel %vm620_vm10, %v616_v25, %v624_v31  ;;  %v631_v37 = vsel %vm623_vm11, %v619_v28, %v627_v32  ;;  %v870_v32 = vld [vmem:[%s1617_s5] sm:$0xf] (!%p1064_p9) }
 0x435   : > { %v1224_v36 = vpack.i.bf16 %v629_v33, %v628_v34  ;;  %v1229_v39 = vpack.i.bf16 %v631_v37, %v630_v38 }
 0x437   : > { %1225 = vrot.lane.b32.xlu1 %v1224_v36, %s1346_s16 }
 0x438   : > { %664 = vrot.lane.b32.xlu0 %v631_v37, %s1344_s13 }
 0x43b   : > { %1230 = vrot.lane.b32.xlu1 %v1229_v39, %s1346_s16 }
 0x43f   : > { %643 = vrot.lane.b32.xlu1 %v628_v34, %s1344_s13 }
 0x443   : > { %662 = vrot.lane.b32.xlu1 %v630_v38, %s1344_s13 }
 0x4a6   : > { %v646_v47 = vpop.permute.xlu0 %645 }
 0x4a9   : > { %v1226_v40 = vpop.permute.xlu1 %1225 }
 0x4aa   : > { %v1228_v41 = vunpack.i.h.bf16 %v1226_v40  ;;  %v1227_v42 = vunpack.i.l.bf16 %v1226_v40  ;;  %v665_v57 = vpop.permute.xlu0 %664 }
 0x4ac   : > { %v639_v43 = vsel %vm638_vm13, %v1227_v42, %v1228_v41  ;;  %v1096_v48 = vpack.c.bf16 %v628_v34, %v1227_v42 }
 0x4ad   : > { %v1231_v44 = vpop.permute.xlu1 %1230  ;;  %v1094_v45 = vpack.c.bf16 %v629_v33, %v639_v43 }
 0x4ae   : > { %v1233_v49 = vunpack.i.h.bf16 %v1231_v44  ;;  %v1232_v50 = vunpack.i.l.bf16 %v1231_v44 }
 0x4af   : > { %1095 = vmatprep.subr.bf16.mxu0 %v1094_v45 }
 0x4b0   : > { %1098 = vmatpush1.bf16.msk.msra.mxu0 %vm1508_vm0, %v1096_v48  ;;  %v658_v51 = vsel %vm638_vm13, %v1232_v50, %v1233_v49  ;;  %v1101_v54 = vpack.c.bf16 %v630_v38, %v1232_v50 }
 0x4b1   : > { %v644_v52 = vpop.permute.xlu1 %643  ;;  %1057 = vmatprep.subr.msk.mxu0 %vm647_vm1, %v646_v47  ;;  %v1099_v53 = vpack.c.bf16 %v631_v37, %v658_v51 }
 0x4b2   : > { %v648_v55 = vsel %vm647_vm1, %v644_v52, %v646_v47 }
 0x4b3   : > { %1100 = vmatprep.subr.bf16.mxu1 %v1099_v53 }
 0x4b4   : > { %680 = vmatpush1.msra.mxu0 %v648_v55  ;;  %1103 = vmatpush1.bf16.msk.msra.mxu1 %vm1508_vm0, %v1101_v54 }
 0x4b5   : > { %v663_v58 = vpop.permute.xlu1 %662  ;;  %1058 = vmatmul.mubr.msk.f32.vlgmr.msra.gmra.mrb[0].mxu0 %vm671_vm2, %v670_v56  ;;  %1061 = vmatprep.subr.msk.mxu1 %vm647_vm1, %v665_v57 }
 0x4b6   : > { %v666_v59 = vsel %vm647_vm1, %v663_v58, %v665_v57 }
 0x4b8   : > { %751 = vmatpush1.msra.mxu1 %v666_v59 }
 0x4b9   : > { %1062 = vmatmul.mubr.msk.f32.vlgmr.msra.gmra.mrb[0].mxu1 %vm671_vm2, %v670_v56 }
 0x588   : > { %v741_v60 = vpop.f32.mrb[0].mxu0 }
 0x589   : > { %v831_v61 = vsel %vm830_vm3, %v741_v60, 0.0  ;;  %v840_v62 = vmul.f32 %v741_v60, %v741_v60  ;;  %v743_v63 = vpop.f32.mrb[1].mxu0 }
 0x58a   : > { %v821_v0 = vcombine.low %v741_v60, %v743_v63  ;;  %v832_v1 = vsel %vm830_vm3, %v743_v63, 0.0  ;;  %v841_v2 = vmul.f32 %v743_v63, %v743_v63 }
 0x58b   : > { %v844_v3 = vsel %vm830_vm3, %v840_v62, 0.0  ;;  %v833_v4 = vadd.f32 %v832_v1, %v831_v61 }
 0x58c   : > { %827 = vst [vmem:[%s826_s23] sm:$0xff] %v821_v0  ;;  %v845_v5 = vsel %vm830_vm3, %v841_v2, 0.0  ;;  %v812_v6 = vpop.f32.mrb[0].mxu1 }
 0x58d   : > { %v846_v7 = vadd.f32 %v845_v5, %v844_v3  ;;  %v834_v8 = vsel %vm830_vm3, %v812_v6, 0.0  ;;  %v842_v9 = vmul.f32 %v812_v6, %v812_v6  ;;  %v814_v10 = vpop.f32.mrb[1].mxu1 }
 0x58e   : > { %v822_v11 = vcombine.low %v812_v6, %v814_v10  ;;  %v836_v12 = vsel %vm830_vm3, %v814_v10, 0.0  ;;  %v843_v13 = vmul.f32 %v814_v10, %v814_v10  ;;  %v835_v14 = vadd.f32 %v834_v8, %v833_v4 }
 0x58f   : > { %v847_v15 = vsel %vm830_vm3, %v842_v9, 0.0 }
 0x590   : > { %828 = vst [vmem:[%s826_s23 + $0x8] sm:$0xff] %v822_v11  ;;  %v837_v16 = vadd.f32 %v836_v12, %v835_v14  ;;  %v848_v17 = vadd.f32 %v847_v15, %v846_v7  ;;  %v849_v18 = vsel %vm830_vm3, %v843_v13, 0.0 }
 0x592   : > { %838 = vadd.xlane.f32.xlu1 %v837_v16  ;;  %v850_v19 = vadd.f32 %v849_v18, %v848_v17 }
 0x594   : > { %851 = vadd.xlane.f32.xlu0 %v850_v19 }
 0x61f   : > { %v839_v21 = vpop.xlane.xlu1 %838  ;;  %860 = sbr.rel (%p1064_p9) target bundleno = 1953 (0x7a1), region = 72 }
 0x621   : > { %v852_v22 = vpop.xlane.xlu0 %851 }
 0x622   : > { %v853_v23 = vsel %vm638_vm13, %v839_v21, %v852_v22 }
 0x623   : > { %v854_v24 = vadd.f32 %v853_v23, %v829_v20 }
 0x625   : > { %856 = vst.msk [vmem:[#allocation5] sm:$0xf] %vm855_vm4, %v854_v24 }
 0x62c   : > { %v861_v25 = vld [vmem:[#allocation5] sm:$0xf] }
 0x62d   : > { %v863_v26 = vmul.f32 0.0009765625, %v861_v25 }
 0x62f   : > { %v864_v27 = vmul.f32 %v863_v26, %v863_v26 }
 0x631   : > { %866 = vrot.lane.b32.xlu0 %v864_v27, %s1348_s9 }
 0x6a3   : > { %v867_v28 = vpop.permute.xlu0 %866 }
 0x6a4   : > { %v869_v29 = vsub.f32 %v863_v26, %v867_v28 }
 0x6a6   : > { %v871_v30 = vadd.f32 1e-05, %v869_v29 }
 0x6a8   : > { %1234 = vrsqrt.f32 %v871_v30 }
 0x6b2   : > { %v1235_v31 = vpop.eup %1234 }
 0x6b3   : > { %874 = vrot.lane.b32.xlu0 %v1235_v31, %s1349_s12 }
 0x725   : > { %v875_v33 = vpop.permute.xlu0 %874 }
 0x726   : > { %v877_v34 = vmul.f32 %v875_v33, %v870_v32 }
 0x728   : > { %v879_v36 = vmul.f32 %v877_v34, %v863_v26 }
 0x72a   : > { %v880_v37 = vsub.f32 %v878_v35, %v879_v36 }
 0x72c   : > { %882 = vrot.lane.b32.xlu1 %v880_v37, %s1348_s9 }
 0x79e   : > { %v883_v38 = vpop.permute.xlu1 %882 }
 0x79f   : > { %v885_v39 = vsel %vm638_vm13, %v877_v34, %v883_v38 }
 0x7a0   : > { %886 = vst.msk [vmem:[#allocation5] sm:$0xf] %vm855_vm4, %v885_v39 }
 0x7a1 PF: > { %p1065_p10 = scmp.ne.s32.totalorder %s1320_s28, 2 }
 0x7a2   : > { %v1350_v41 = vmov (!%p1065_p10), 0   ;;  %v1351_v42 = vmov (!%p1065_p10), 1   ;;  %v1352_v43 = vmov (!%p1065_p10), 839922192   ;;  %v904_v45 = vlaneseq (!%p1065_p10)  ;;  %s1079_s22 = sshll.u32 (!%p1065_p10), %s1316_s27, 4 }
 0x7a3   : > { %890 = sbr.rel (%p1065_p10) target bundleno = 2101 (0x835), region = 76  ;;  %1236 = vset.pattern.permute.xlu0 (!%p1065_p10), %v1350_v41  ;;  %v902_v44 = vunpack.c.l.s4 (!%p1065_p10), %v1352_v43  ;;  %s893_s23 = scalar_lea.vmem (!%p1065_p10), [#allocation3], %s1079_s22 }
 0x7a4   : > { %v905_v47 = vshrl.u32 (!%p1065_p10), %v904_v45, 7  ;;  %v894_v51 = vld [vmem:[%s893_s23] sm:$0xff] (!%p1065_p10)  ;;  %v895_v52 = vld [vmem:[%s893_s23 + $0x8] sm:$0xff] (!%p1065_p10) }
 0x7a5   : > { %v903_v46 = vunpack.c.0.s8 (!%p1065_p10), %v902_v44 }
 0x7a7   : > { %v896_v40 = vld [vmem:[#allocation5] sm:$0xf] (!%p1065_p10)  ;;  %v906_v48 = vsub.s32 (!%p1065_p10), %v903_v46, %v905_v47 }
 0x7a8   : > { %899 = vperm.xlu0 (!%p1065_p10), %1236, %v896_v40  }
 0x7ac   : > { %1237 = vset.pattern.permute.xlu0 %v1351_v42 }
 0x7ad   : > { %912 = vperm.xlu0 %1237, %v896_v40  }
 0x827   : > { %v900_v49 = vpop.permute.xlu0 %899 }
 0x828   : > { %v907_v50 = vrot.slane %v900_v49, %v906_v48 }
 0x82a   : > { %v909_v54 = vmul.f32 %v907_v50, %v894_v51  ;;  %v910_v55 = vmul.f32 %v907_v50, %v895_v52 }
 0x82c   : > { %v913_v53 = vpop.permute.xlu0 %912 }
 0x82d   : > { %v920_v56 = vrot.slane %v913_v53, %v906_v48 }
 0x82f   : > { %v922_v57 = vadd.f32 %v920_v56, %v909_v54  ;;  %v923_v58 = vadd.f32 %v920_v56, %v910_v55 }
 0x831   : > { %vm924_vm5 = vcmp.ge.f32.partialorder %v922_v57, 0.0  ;;  %vm925_vm6 = vcmp.ge.f32.partialorder %v923_v58, 0.0  ;;  %v926_v59 = vmul.f32 0.01, %v922_v57  ;;  %v927_v60 = vmul.f32 0.01, %v923_v58 }
 0x833   : > { %v928_v61 = vsel %vm924_vm5, %v922_v57, %v926_v59  ;;  %v929_v62 = vsel %vm925_vm6, %v923_v58, %v927_v60 }
 0x834   : > { %930 = vst [vmem:[%s1475_s17] sm:$0xff] %v928_v61  ;;  %1068 = vst [vmem:[%s1475_s17 + $0x8] sm:$0xff] %v929_v62 }
 0x835 PF: > { %p941_p11 = scmp.eq.s32.totalorder %s1320_s28, 2  ;;  %s950_s9 = sshll.u32 %s1475_s17, 4  ;;  %s1551_s9 = int_to_ptr.vmem [resolvable:$true] %s950_s9 }
 0x836   : > { %s1560_s21 = scalar_lea.sflag [#allocation7], %s298_s20  ;;  %s1238_s22 = scalar_lea.vmem %s1551_s9, 256 }
 0x837   : > { %s1640_s27 = smov (!%p941_p11, %s1316_s27), 0  ;;  %p1239_p12 = scmp.ne.s32.totalorder %s1551_s9, %s1238_s22 }
 0x838   : > { %s1081_s12 = sshll.u32 %s1640_s27, 8  ;;  %s1353_s28 = smov [#allocation6]  }
 0x839   : > { %s1556_s18 = scalar_lea.hbm %s1619_s7, %s1081_s12  ;;  %p1240_p13 = pnand %p1239_p12, %p1451_p7 }
 0x83a   : > { %s1242_s17 = sshll.u32 %s1353_s28, 4  ;;  %s1243_s17 = int_to_ptr.vmem [resolvable:$false] %s1242_s17 }
 0x83b   : > { %p1241_p0 = pneg %p1240_p13  ;;  %s1244_s23 = scalar_lea.vmem %s1243_s17, 512 }
 0x83c   : > { %p1245_p1 = scmp.lt.s32.totalorder %s1551_s9, %s1243_s17  ;;  %p1246_p2 = scmp.lt.s32.totalorder %s1244_s23, %s1238_s22 }
 0x83e   : > { %p1247_p3 = por %p1246_p2, %p1245_p1 }
 0x840   : > { %p1248_p4 = pnand %p1247_p3, %p1241_p0 }
 0x842   : > { %1251 = shalt.err (!%p1248_p4)
}
 0x843   : > { %s1252_s27 = scalar_lea.hbm %s1556_s18, 256  ;;  %s1256_s13 = scalar_lea.hbm %s1619_s7, 512 }
 0x844   : > { %p1253_p5 = scmp.ne.s32.totalorder %s1556_s18, %s1252_s27  ;;  %p1257_p10 = scmp.lt.u32.totalorder %s1556_s18, %s1619_s7 }
 0x845   : > { %p1258_p11 = scmp.lt.u32.totalorder %s1256_s13, %s1252_s27  ;;  %p1260_p13 = scmp.lt.u32.totalorder %s1252_s27, %s1556_s18 }
 0x846   : > { %p1254_p6 = pnand %p1253_p5, %p1451_p7 }
 0x847   : > { %p1259_p12 = por %p1258_p11, %p1257_p10 }
 0x848   : > { %p1255_p9 = pneg %p1254_p6 }
 0x849   : > { %p1261_p0 = por %p1260_p13, %p1259_p12 }
 0x84b   : > { %p1262_p1 = pnand %p1261_p0, %p1255_p9 }
 0x84d   : > { %1265 = shalt.err (!%p1262_p1)
}
 0x84e   : > { %s1354_s22 = smov 128   ;;  %s1355_s17 = smov 8  }
 0x84f   : > { %1104 = dma.vmem_to_hbm [thread:$0]  (%p1451_p7), %s1551_s9, 256, %s1556_s18, %s1560_s21, %s1354_s22, %s1354_s22, %s1355_s17  }
 0x850 PF: > { %p1110_p2 = scmp.ge.s32.totalorder %s1332_s8, 2  ;;  %s965_s23 = sand.u32 1, %s1304_s24  }
 0x851   : > { %s966_s27 = scalar_lea.sflag [#allocation7], %s965_s23 }
 0x852   : > { %p1107_p3 = pnand %p1110_p2, %p1455_p8 }
 0x854   : > { %1299 = dma.done.wait (!%p1107_p3), %s966_s27, 256  }
 0x855   : > { %1301 = vsyncadd (!%p1107_p3), %s966_s27, 4294967040  ;;  %s20_s8 = sadd.s32 1, %s1332_s8   ;;  %s1624_s24 = smov %s1308_s25 }
 0x856   : > { %p17_p4 = scmp.ge.s32.totalorder %s20_s8, 8   ;;  %s1625_s25 = smov %s1312_s26 }
 0x857   : > { %s1626_s26 = smov %s1465_s19  ;;  %s1627_s27 = smov %s1324_s29 }
 0x858   : > { %s1628_s28 = smov %s1328_s30  ;;  %s1629_s29 = smov %s1632_s10 }
 0x859   : > { %s1630_s30 = smov %s1636_s11  ;;  %19 = sbr.rel (!%p17_p4) target bundleno = 5 (0x5), region = 116 }
 0x860   :  { %971 = vsyncpa [#allocation7], 1 }
 0x861   :  { %973 = vsyncpa [#allocation7 + $0x1], 1 }

</bundles_post_ra>
